<compile_context>
chip_gen: v5e
topology: v5e:2x2
jax: 0.10.0
libtpu: 0.0.40
codegen_flags: <defaults>
</compile_context>

<pallas_src>
import functools

import jax
import jax.numpy as jnp
from jax.experimental import pallas as pl
from jax.experimental.pallas import tpu as pltpu


def _round_up(n, m):
    return ((n + m - 1) // m) * m


def _pad_dim(n):
    # Pad to a lane-friendly multiple of 128 only when the dim already exceeds
    # 128; tiny dims use full-array blocks instead (cheaper than pad + slice).
    return n if n <= 128 else _round_up(n, 128)


def _pick_tile(dim, candidates=(512, 256, 128)):
    # Largest candidate that divides `dim` (padded dims >128 are multiples of
    # 128 by construction, so this always succeeds); tiny dims = one block.
    if dim <= candidates[-1]:
        return dim
    for c in candidates:
        if dim % c == 0:
            return c
    return candidates[-1]


def _vmem_limit_bytes():
    # ~75% of physical VMEM per core: ~48 MiB on v7x, ~96 MiB on v5e/v6e.
    try:
        cap = int(pltpu.get_tpu_info().vmem_capacity_bytes)
    except Exception:
        cap = 64 * 1024 * 1024
    return cap * 3 // 4


def prepare_linear_params(weight, bias, compute_dtype=None):
    """One-time layout plumbing, hoisted out of the per-call forward.

    weight: [C, F] (PyTorch nn.Linear layout), bias: [C].
    Returns (w_t [Fp, Cp], b_row [1, Cp] f32): W pre-transposed so the MXU sees
    a canonical (K-last x K-first) contraction, zero-padded to lane-friendly
    sizes (exact after the final slice).  compute_dtype=jnp.bfloat16 enables
    the half-bandwidth weight path (accumulation stays f32 in the kernel).
    """
    C, F = weight.shape
    Fp, Cp = _pad_dim(F), _pad_dim(C)
    w_t = weight.T
    if compute_dtype is not None:
        w_t = w_t.astype(compute_dtype)
    if (Fp, Cp) != (F, C):
        w_t = jnp.pad(w_t, ((0, Fp - F), (0, Cp - C)))
    b_row = jnp.pad(bias.astype(jnp.float32), (0, Cp - C)).reshape(1, Cp)
    return w_t, b_row


def _linear_small_kernel(x_ref, w_ref, b_ref, o_ref):
    # x: [B, Fp], w: [Fp, Cp], b: [1, Cp], o: [B, Cp]
    acc = jnp.dot(x_ref[...], w_ref[...], preferred_element_type=jnp.float32)
    o_ref[...] = (acc + b_ref[...]).astype(o_ref.dtype)


def _linear_tiled_kernel(x_ref, w_ref, b_ref, o_ref, acc_ref):
    # grid = (B tiles, C tiles, K tiles); K is last / "arbitrary" (P3 pattern).
    k = pl.program_id(2)

    @pl.when(k == 0)
    def _():
        acc_ref[...] = jnp.zeros_like(acc_ref)

    acc_ref[...] += jnp.dot(x_ref[...], w_ref[...],
                            preferred_element_type=jnp.float32)

    @pl.when(k == pl.num_programs(2) - 1)
    def _():
        o_ref[...] = (acc_ref[...] + b_ref[...]).astype(o_ref.dtype)


def private_classifier_forward(x, w_t, b_row, num_classes, *,
                               batch_tile=512,
                               small_path_bytes=4 * 1024 * 1024):
    """y = x @ weight.T + bias (torch.nn.Linear.forward).

    x: [B, F]; (w_t, b_row) from prepare_linear_params; returns [B, num_classes].
    """
    B, F = x.shape
    Fp, Cp = w_t.shape
    C = num_classes
    out_dtype = x.dtype

    # Optional bf16 compute path: cast activations to the weight dtype; the
    # accumulation inside the kernel stays f32 and output keeps x's dtype.
    if x.dtype != w_t.dtype:
        x = x.astype(w_t.dtype)
    # Match the (one-time) feature padding of the prepared weight.
    if Fp != F:
        x = jnp.pad(x, ((0, 0), (0, Fp - F)))

    x_item = jnp.dtype(x.dtype).itemsize
    w_item = jnp.dtype(w_t.dtype).itemsize
    o_item = jnp.dtype(out_dtype).itemsize
    vmem_limit = _vmem_limit_bytes()
    working_set = B * Fp * x_item + Fp * Cp * w_item + 4 * Cp + B * Cp * o_item
    cost = pl.CostEstimate(flops=2 * B * Fp * Cp, transcendentals=0,
                           bytes_accessed=working_set)

    if working_set <= small_path_bytes:
        # Small problem: one gridless call, full-array blocks, no pipeline
        # machinery (~600-cycle/step floor avoided), no extra pad/slice ops.
        y = pl.pallas_call(
            _linear_small_kernel,
            out_shape=jax.ShapeDtypeStruct((B, Cp), out_dtype),
            in_specs=[
                pl.BlockSpec((B, Fp), lambda: (0, 0)),
                pl.BlockSpec((Fp, Cp), lambda: (0, 0)),
                pl.BlockSpec((1, Cp), lambda: (0, 0)),
            ],
            out_specs=pl.BlockSpec((B, Cp), lambda: (0, 0)),
            compiler_params=pltpu.CompilerParams(vmem_limit_bytes=vmem_limit),
            cost_estimate=cost,
        )(x, w_t, b_row)
    else:
        # Tiled path: grid over (B, C, K).  Only one (tile_k, tile_c) weight
        # tile is resident at a time (double-buffered by BlockSpec), so large
        # classifier heads stream through <= ~7 MiB of VMEM on any generation.
        Bp = _round_up(B, 8)
        if Bp != B:
            x = jnp.pad(x, ((0, Bp - B), (0, 0)))   # <=7 rows; no tile-size re-pad
        tile_b = min(batch_tile, Bp)
        tile_c = _pick_tile(Cp)
        tile_k = _pick_tile(Fp)
        grid = (pl.cdiv(Bp, tile_b), pl.cdiv(Cp, tile_c), Fp // tile_k)

        y = pl.pallas_call(
            _linear_tiled_kernel,
            out_shape=jax.ShapeDtypeStruct((Bp, Cp), out_dtype),
            grid=grid,
            in_specs=[
                pl.BlockSpec((tile_b, tile_k), lambda i, j, k: (i, k)),
                pl.BlockSpec((tile_k, tile_c), lambda i, j, k: (k, j)),
                pl.BlockSpec((1, tile_c), lambda i, j, k: (0, j)),
            ],
            out_specs=pl.BlockSpec((tile_b, tile_c), lambda i, j, k: (i, j)),
            scratch_shapes=[pltpu.VMEM((tile_b, tile_c), jnp.float32)],
            compiler_params=pltpu.CompilerParams(
                dimension_semantics=("parallel", "parallel", "arbitrary"),
                vmem_limit_bytes=vmem_limit,
            ),
            cost_estimate=cost,
        )(x, w_t, b_row)
        if Bp != B:
            y = y[:B]

    return y[:, :C] if Cp != C else y


if __name__ == "__main__":
    key = jax.random.PRNGKey(0)
    kx, kw, kb, kx2, kw2, kb2 = jax.random.split(key, 6)

    # --- Tiny demo shapes (matches the PyTorch module's toy usage) ----------
    input_features, num_classes, batch = 32, 10, 8
    x = jax.random.normal(kx, (batch, input_features), dtype=jnp.float32)
    bound = 1.0 / (input_features ** 0.5)          # PyTorch default Linear init
    weight = jax.random.uniform(kw, (num_classes, input_features),
                                minval=-bound, maxval=bound, dtype=jnp.float32)
    bias = jax.random.uniform(kb, (num_classes,), minval=-bound, maxval=bound,
                              dtype=jnp.float32)

    w_t, b_row = prepare_linear_params(weight, bias)   # one-time, outside jit
    fwd = jax.jit(functools.partial(private_classifier_forward,
                                    num_classes=num_classes))
    y = jax.block_until_ready(fwd(x, w_t, b_row))
    y_ref = x @ weight.T + bias
    assert y.shape == (batch, num_classes)
    assert jnp.allclose(y, y_ref, atol=1e-4, rtol=1e-4), \
        float(jnp.max(jnp.abs(y - y_ref)))

    # --- Exercise the tiled (B, C, K) accumulator path on modest shapes -----
    B2, F2, C2 = 100, 384, 272
    x2 = jax.random.normal(kx2, (B2, F2), dtype=jnp.float32)
    bound2 = 1.0 / (F2 ** 0.5)
    weight2 = jax.random.uniform(kw2, (C2, F2), minval=-bound2, maxval=bound2,
                                 dtype=jnp.float32)
    bias2 = jax.random.uniform(kb2, (C2,), minval=-bound2, maxval=bound2,
                               dtype=jnp.float32)
    w_t2, b_row2 = prepare_linear_params(weight2, bias2)
    fwd2 = jax.jit(functools.partial(private_classifier_forward,
                                     num_classes=C2, small_path_bytes=0))
    y2 = jax.block_until_ready(fwd2(x2, w_t2, b_row2))
    y2_ref = x2 @ weight2.T + bias2
    assert y2.shape == (B2, C2)
    assert jnp.allclose(y2, y2_ref, atol=2e-3, rtol=2e-3), \
        float(jnp.max(jnp.abs(y2 - y2_ref)))

    print("KERNEL_OK")
</pallas_src>

<mosaic_0001>
module attributes {stable_mosaic.version = 11 : i64} {
  func.func @_linear_small_kernel(%arg0: memref<8x32xf32, #tpu.memory_space<vmem>>, %arg1: memref<32x10xf32, #tpu.memory_space<vmem>>, %arg2: memref<1x10xf32, #tpu.memory_space<vmem>>, %arg3: memref<8x10xf32, #tpu.memory_space<vmem>>) attributes {dimension_semantics = [], scalar_prefetch = 0 : i64, scratch_operands = 0 : i64, tpu.core_type = #tpu.core_type<tc>} {
    %c0 = arith.constant 0 : index
    %c0_0 = arith.constant 0 : index
    %0 = vector.load %arg0[%c0, %c0_0] : memref<8x32xf32, #tpu.memory_space<vmem>>, vector<8x32xf32>
    %c0_1 = arith.constant 0 : index
    %c0_2 = arith.constant 0 : index
    %1 = vector.load %arg1[%c0_1, %c0_2] : memref<32x10xf32, #tpu.memory_space<vmem>>, vector<32x10xf32>
    %cst = arith.constant dense<0.000000e+00> : vector<8x10xf32>
    %2 = tpu.matmul %0, %1, %cst {dimension_numbers = #tpu.dot_dimension_numbers<[1], [0], [0], [1], [0, 0, 1, 1], [], []>} : vector<8x32xf32>, vector<32x10xf32>, vector<8x10xf32> -> vector<8x10xf32>
    %c0_3 = arith.constant 0 : index
    %c0_4 = arith.constant 0 : index
    %3 = vector.load %arg2[%c0_3, %c0_4] : memref<1x10xf32, #tpu.memory_space<vmem>>, vector<1x10xf32>
    %4 = vector.broadcast %3 : vector<1x10xf32> to vector<8x10xf32>
    %5 = arith.addf %2, %4 : vector<8x10xf32>
    %c0_5 = arith.constant 0 : index
    %c0_6 = arith.constant 0 : index
    %6 = vector.load %arg3[%c0_5, %c0_6] : memref<8x10xf32, #tpu.memory_space<vmem>>, vector<8x10xf32>
    tpu.vector_store %arg3[%c0_5, %c0_6], %5 {strides = array<i32>} : memref<8x10xf32, #tpu.memory_space<vmem>>, vector<8x10xf32>,
    return
  }
}

</mosaic_0001>

<bundles_post_ra>
// kernel: private_classifier_forward.1
= control target key start
LH: loop header
LB: loop body
LE: loop exit
PB: predicated region body
PF: predicated region fallthrough
CT: control target
= control target key end

     0   :  { %s137_s0 = inlined_call_operand.vmem [shape: f32[8,32], index: 0, kind: input, shape index: {}]   ;;  %s138_s1 = inlined_call_operand.vmem [shape: f32[32,10], index: 1, kind: input, shape index: {}]   ;;  %s139_s2 = inlined_call_operand.vmem [shape: f32[1,10], index: 2, kind: input, shape index: {}]   ;;  %s140_s3 = inlined_call_operand.hbm [shape: f32[8,10], index: 3, kind: output, shape index: {}]  }
   0x1   :  { %v19_v0 = vld [vmem:[%s138_s1 + $0x18] sm:$0xff]  ;;  %v18_v1 = vld [vmem:[%s138_s1 + $0x10] sm:$0xff]  ;;  %v17_v2 = vld [vmem:[%s138_s1 + $0x8] sm:$0xff] }
   0x2   :  { %40 = vmatpush.msra.mxu0 %v19_v0 }
   0x3   :  { %8 = vsyncpa [#allocation3], 0  ;;  %v16_v3 = vld [vmem:[%s138_s1] sm:$0xff]  ;;  %vm24_vm0 = vcmask 261120   ;;  %s95_s24 = smov [#allocation2]   ;;  %s57_s28 = sshll.u32 %s140_s3, 4  ;;  %s58_s28 = int_to_ptr.hbm [resolvable:$true] %s57_s28 }
   0x4   :  { %41 = vmatpush.msra.mxu0 %v18_v1  ;;  %v15_v4 = vld [vmem:[%s137_s0] sm:$0xff]  ;;  %s55_s25 = sshll.u32 %s95_s24, 4  ;;  %vm48_vm1 = vcmask 80896   ;;  %s56_s25 = int_to_ptr.vmem [resolvable:$true] %s55_s25 }
   0x5   :  { %v68_v5 = vld [vmem:[%s139_s2] ss:$0 sm:$0xff] }
   0x6   :  { %42 = vmatpush.msra.mxu0 %v17_v2 }
   0x8   :  { %43 = vmatpush.msra.mxu0 %v16_v3 }
   0x9   :  { %66 = vmatmul.msk.f32.vlgmr.msra.gmra.mxu0 %vm24_vm0, %v15_v4 }
  0x86   :  { %v45_v6 = vpop.f32.mrf.mxu0 }
  0x87   :  { %v46_v7 = vadd.f32 %v68_v5, %v45_v6 }
  0x89   :  { %49 = vst.msk [vmem:[#allocation2] sm:$0xff] %vm48_vm1, %v46_v7 }
  0x8a   :  { %60 = dma.vmem_to_hbm [thread:$0]  %s56_s25, 128, %s58_s28, [#allocation3]  }
  0x8b   :  { %93 = dma.done.wait [#allocation3], 128  }
  0x8c   :  { %94 = vsyncadd [#allocation3], 4294967168 }
  0x8d   :  { %65 = vsyncpa [#allocation3], 1 }

</bundles_post_ra>
